<compile_context>
chip_gen: v7x
topology: tpu7x:2x2x1
jax: 0.10.0
libtpu: 0.0.40
codegen_flags: <defaults>
</compile_context>

<pallas_src>
import functools

import jax
import jax.numpy as jnp
from jax.experimental import pallas as pl
from jax.experimental.pallas import tpu as pltpu


def _round_up(x, m):
    return ((x + m - 1) // m) * m


def _choose_tile(dim, max_tile, align):
    """Return (tile, padded_dim).

    Prefers a full-dimension block for small dims, then a 128-aligned divisor of
    `dim` (no padding), and finally pads `dim` up to a multiple of `max_tile`.
    """
    if dim <= max_tile:
        return dim, dim
    best = 0
    for cand in range(align, max_tile + 1, align):
        if dim % cand == 0:
            best = cand
    if best:
        return best, dim
    padded = _round_up(dim, max_tile)
    return max_tile, padded


def glu_kernel(x_ref, wv_ref, wg_ref, bv_ref, bg_ref, o_ref, accv_ref, accg_ref):
    """One (tm, tn) output tile, accumulated over the K grid axis.

    x_ref  : (tm, tk)   VMEM  activations
    wv_ref : (tk, tn)   VMEM  value-half weights (mult_bias pre-folded)
    wg_ref : (tk, tn)   VMEM  gate-half weights
    bv_ref : (1, tn)    VMEM  f32 value bias (mult_bias pre-folded)
    bg_ref : (1, tn)    VMEM  f32 gate bias
    o_ref  : (tm, tn)   VMEM  output tile
    accv_ref, accg_ref : (tm, tn) f32 VMEM accumulators (persist across K steps)
    """
    k = pl.program_id(2)

    @pl.when(k == 0)
    def _():
        accv_ref[...] = jnp.zeros_like(accv_ref)
        accg_ref[...] = jnp.zeros_like(accg_ref)

    x = x_ref[...]
    accv_ref[...] += jnp.dot(x, wv_ref[...], preferred_element_type=jnp.float32)
    accg_ref[...] += jnp.dot(x, wg_ref[...], preferred_element_type=jnp.float32)

    @pl.when(k == pl.num_programs(2) - 1)
    def _():
        v = accv_ref[...] + bv_ref[...]
        g = accg_ref[...] + bg_ref[...]
        # SiLU gate (sigmoid runs on the EUP), elementwise product, f32 epilogue.
        o_ref[...] = (v * (g * jax.nn.sigmoid(g))).astype(o_ref.dtype)


@functools.partial(jax.jit, static_argnames=("tm", "tn", "tk"))
def glu_forward(x, w_t, b, mult_bias, *, tm=512, tn=512, tk=512):
    """GLU forward.

    x        : (B, S, dim_in)
    w_t      : (dim_in, 2*dim_out)   (nn.Linear weight, transposed so the kernel does x @ W)
    b        : (2*dim_out,)
    mult_bias: (dim_out,)
    """
    B, S, dim_in = x.shape
    two_dim_out = w_t.shape[1]
    dim_out = two_dim_out // 2
    M = B * S

    # Fold mult_bias into the value-half parameters (exact: (xWv+bv)*mb == x(Wv*mb)+bv*mb).
    w_v = (w_t[:, :dim_out] * mult_bias[None, :]).astype(x.dtype)
    w_g = w_t[:, dim_out:].astype(x.dtype)
    b_v = (b[:dim_out] * mult_bias).reshape(1, dim_out).astype(jnp.float32)
    b_g = b[dim_out:].reshape(1, dim_out).astype(jnp.float32)

    # Tile selection: large MXU-filling tiles for real shapes, graceful fallback
    # (full-dimension blocks / padding) for small or unaligned dims.
    tm_eff = min(tm, _round_up(M, 8))
    tn_eff, N_pad = _choose_tile(dim_out, tn, 128)
    tk_eff, K_pad = _choose_tile(dim_in, tk, 128)
    M_pad = _round_up(M, tm_eff)

    x2d = x.reshape(M, dim_in)
    if (M_pad != M) or (K_pad != dim_in):
        x2d = jnp.pad(x2d, ((0, M_pad - M), (0, K_pad - dim_in)))
    if (K_pad != dim_in) or (N_pad != dim_out):
        pad_w = ((0, K_pad - dim_in), (0, N_pad - dim_out))
        w_v = jnp.pad(w_v, pad_w)
        w_g = jnp.pad(w_g, pad_w)
    if N_pad != dim_out:
        pad_b = ((0, 0), (0, N_pad - dim_out))
        b_v = jnp.pad(b_v, pad_b)
        b_g = jnp.pad(b_g, pad_b)

    grid = (M_pad // tm_eff, N_pad // tn_eff, K_pad // tk_eff)

    out2d = pl.pallas_call(
        glu_kernel,
        out_shape=jax.ShapeDtypeStruct((M_pad, N_pad), x.dtype),
        grid_spec=pltpu.PrefetchScalarGridSpec(
            num_scalar_prefetch=0,
            grid=grid,
            in_specs=[
                pl.BlockSpec((tm_eff, tk_eff), lambda i, j, k: (i, k)),   # x
                pl.BlockSpec((tk_eff, tn_eff), lambda i, j, k: (k, j)),   # W_v
                pl.BlockSpec((tk_eff, tn_eff), lambda i, j, k: (k, j)),   # W_g
                pl.BlockSpec((1, tn_eff), lambda i, j, k: (0, j)),        # b_v
                pl.BlockSpec((1, tn_eff), lambda i, j, k: (0, j)),        # b_g
            ],
            out_specs=pl.BlockSpec((tm_eff, tn_eff), lambda i, j, k: (i, j)),
            scratch_shapes=[
                pltpu.VMEM((tm_eff, tn_eff), jnp.float32),
                pltpu.VMEM((tm_eff, tn_eff), jnp.float32),
            ],
        ),
        compiler_params=pltpu.CompilerParams(
            dimension_semantics=("parallel", "parallel", "arbitrary"),
            vmem_limit_bytes=48 * 1024 * 1024,
        ),
    )(x2d, w_v, w_g, b_v, b_g)

    if (M_pad != M) or (N_pad != dim_out):
        out2d = out2d[:M, :dim_out]
    return out2d.reshape(B, S, dim_out)


def glu_reference(x, w_t, b, mult_bias):
    proj = jnp.einsum("bsi,io->bso", x.astype(jnp.float32), w_t.astype(jnp.float32)) + b
    dim_out = w_t.shape[1] // 2
    value, gate = proj[..., :dim_out], proj[..., dim_out:]
    return (value * jax.nn.silu(gate) * mult_bias).astype(x.dtype)


def _make_inputs(key, B, S, dim_in, dim_out, dtype):
    kx, kw, kb, km = jax.random.split(key, 4)
    x = jax.random.normal(kx, (B, S, dim_in), dtype=jnp.float32).astype(dtype)
    # torch.nn.Linear(dim_in, 2*dim_out) -> weight (2*dim_out, dim_in); stored transposed.
    w = jax.random.normal(kw, (2 * dim_out, dim_in), dtype=jnp.float32) * (1.0 / jnp.sqrt(dim_in))
    w_t = w.T.astype(dtype)
    b = (jax.random.normal(kb, (2 * dim_out,), dtype=jnp.float32) * 0.01)
    # mult_bias parameter: initialized to torch.ones(dim_out); perturb slightly so the
    # fold into W_v/b_v is actually exercised.
    mult_bias = 1.0 + 0.01 * jax.random.normal(km, (dim_out,), dtype=jnp.float32)
    return x, w_t, b, mult_bias


if __name__ == "__main__":
    key = jax.random.PRNGKey(0)
    k1, k2 = jax.random.split(key)

    # Small shapes: batch=2, seq=8, dim_in=32, dim_out=64 (full-dimension blocks).
    x, w_t, b, mb = _make_inputs(k1, 2, 8, 32, 64, jnp.float32)
    out = jax.block_until_ready(glu_forward(x, w_t, b, mb))
    ref = glu_reference(x, w_t, b, mb)
    assert out.shape == (2, 8, 64)
    assert jnp.allclose(out, ref, atol=1e-5, rtol=1e-5), "mismatch vs reference (small)"

    # Slightly larger aligned shapes to exercise the tiled multi-K path.
    x, w_t, b, mb = _make_inputs(k2, 2, 64, 256, 256, jnp.float32)
    out = jax.block_until_ready(glu_forward(x, w_t, b, mb, tm=128, tn=128, tk=128))
    ref = glu_reference(x, w_t, b, mb)
    assert out.shape == (2, 64, 256)
    assert jnp.allclose(out, ref, atol=1e-4, rtol=1e-4), "mismatch vs reference (tiled)"

    print("KERNEL_OK")
</pallas_src>

<mosaic_0001>
module attributes {stable_mosaic.version = 11 : i64} {
  func.func @glu_kernel(%arg0: i32, %arg1: i32, %arg2: i32, %arg3: memref<16x32xf32, #tpu.memory_space<vmem>>, %arg4: memref<32x64xf32, #tpu.memory_space<vmem>>, %arg5: memref<32x64xf32, #tpu.memory_space<vmem>>, %arg6: memref<1x64xf32, #tpu.memory_space<vmem>>, %arg7: memref<1x64xf32, #tpu.memory_space<vmem>>, %arg8: memref<16x64xf32, #tpu.memory_space<vmem>>, %arg9: memref<16x64xf32, #tpu.memory_space<vmem>>, %arg10: memref<16x64xf32, #tpu.memory_space<vmem>>) attributes {dimension_semantics = [#tpu.dimension_semantics<parallel>, #tpu.dimension_semantics<parallel>, #tpu.dimension_semantics<arbitrary>], iteration_bounds = array<i64: 1, 1, 1>, scalar_prefetch = 0 : i64, scratch_operands = 2 : i64, tpu.core_type = #tpu.core_type<tc>, window_params = [{transform_indices = @transform_0, window_bounds = array<i64: 16, 32>}, {transform_indices = @transform_1, window_bounds = array<i64: 32, 64>}, {transform_indices = @transform_2, window_bounds = array<i64: 32, 64>}, {transform_indices = @transform_3, window_bounds = array<i64: 1, 64>}, {transform_indices = @transform_4, window_bounds = array<i64: 1, 64>}, {transform_indices = @transform_5, window_bounds = array<i64: 16, 64>}]} {
    %c0_i32 = arith.constant 0 : i32
    %0 = arith.cmpi eq, %arg2, %c0_i32 : i32
    %1 = arith.extui %0 : i1 to i32
    %c0_i32_0 = arith.constant 0 : i32
    %2 = arith.cmpi ne, %1, %c0_i32_0 : i32
    scf.if %2 {
      %cst_17 = arith.constant 0.000000e+00 : f32
      %17 = vector.broadcast %cst_17 : f32 to vector<16x64xf32>
      %c0_18 = arith.constant 0 : index
      %c0_19 = arith.constant 0 : index
      %18 = vector.load %arg9[%c0_18, %c0_19] : memref<16x64xf32, #tpu.memory_space<vmem>>, vector<16x64xf32>
      tpu.vector_store %arg9[%c0_18, %c0_19], %17 {strides = array<i32>} : memref<16x64xf32, #tpu.memory_space<vmem>>, vector<16x64xf32>,
      %cst_20 = arith.constant 0.000000e+00 : f32
      %19 = vector.broadcast %cst_20 : f32 to vector<16x64xf32>
      %c0_21 = arith.constant 0 : index
      %c0_22 = arith.constant 0 : index
      %20 = vector.load %arg10[%c0_21, %c0_22] : memref<16x64xf32, #tpu.memory_space<vmem>>, vector<16x64xf32>
      tpu.vector_store %arg10[%c0_21, %c0_22], %19 {strides = array<i32>} : memref<16x64xf32, #tpu.memory_space<vmem>>, vector<16x64xf32>,
    } else {
    }
    %c0 = arith.constant 0 : index
    %c0_1 = arith.constant 0 : index
    %3 = vector.load %arg3[%c0, %c0_1] : memref<16x32xf32, #tpu.memory_space<vmem>>, vector<16x32xf32>
    %c0_2 = arith.constant 0 : index
    %c0_3 = arith.constant 0 : index
    %4 = vector.load %arg9[%c0_2, %c0_3] : memref<16x64xf32, #tpu.memory_space<vmem>>, vector<16x64xf32>
    %c0_4 = arith.constant 0 : index
    %c0_5 = arith.constant 0 : index
    %5 = vector.load %arg4[%c0_4, %c0_5] : memref<32x64xf32, #tpu.memory_space<vmem>>, vector<32x64xf32>
    %cst = arith.constant dense<0.000000e+00> : vector<16x64xf32>
    %6 = tpu.matmul %3, %5, %cst {dimension_numbers = #tpu.dot_dimension_numbers<[1], [0], [0], [1], [0, 0, 1, 1], [], []>} : vector<16x32xf32>, vector<32x64xf32>, vector<16x64xf32> -> vector<16x64xf32>
    %7 = arith.addf %4, %6 : vector<16x64xf32>
    %c0_6 = arith.constant 0 : index
    %c0_7 = arith.constant 0 : index
    %8 = vector.load %arg9[%c0_6, %c0_7] : memref<16x64xf32, #tpu.memory_space<vmem>>, vector<16x64xf32>
    tpu.vector_store %arg9[%c0_6, %c0_7], %7 {strides = array<i32>} : memref<16x64xf32, #tpu.memory_space<vmem>>, vector<16x64xf32>,
    %c0_8 = arith.constant 0 : index
    %c0_9 = arith.constant 0 : index
    %9 = vector.load %arg10[%c0_8, %c0_9] : memref<16x64xf32, #tpu.memory_space<vmem>>, vector<16x64xf32>
    %c0_10 = arith.constant 0 : index
    %c0_11 = arith.constant 0 : index
    %10 = vector.load %arg5[%c0_10, %c0_11] : memref<32x64xf32, #tpu.memory_space<vmem>>, vector<32x64xf32>
    %cst_12 = arith.constant dense<0.000000e+00> : vector<16x64xf32>
    %11 = tpu.matmul %3, %10, %cst_12 {dimension_numbers = #tpu.dot_dimension_numbers<[1], [0], [0], [1], [0, 0, 1, 1], [], []>} : vector<16x32xf32>, vector<32x64xf32>, vector<16x64xf32> -> vector<16x64xf32>
    %12 = arith.addf %9, %11 : vector<16x64xf32>
    %c0_13 = arith.constant 0 : index
    %c0_14 = arith.constant 0 : index
    %13 = vector.load %arg10[%c0_13, %c0_14] : memref<16x64xf32, #tpu.memory_space<vmem>>, vector<16x64xf32>
    tpu.vector_store %arg10[%c0_13, %c0_14], %12 {strides = array<i32>} : memref<16x64xf32, #tpu.memory_space<vmem>>, vector<16x64xf32>,
    %c0_i32_15 = arith.constant 0 : i32
    %14 = arith.cmpi eq, %arg2, %c0_i32_15 : i32
    %15 = arith.extui %14 : i1 to i32
    %c0_i32_16 = arith.constant 0 : i32
    %16 = arith.cmpi ne, %15, %c0_i32_16 : i32
    scf.if %16 {
      %c0_17 = arith.constant 0 : index
      %c0_18 = arith.constant 0 : index
      %17 = vector.load %arg9[%c0_17, %c0_18] : memref<16x64xf32, #tpu.memory_space<vmem>>, vector<16x64xf32>
      %c0_19 = arith.constant 0 : index
      %c0_20 = arith.constant 0 : index
      %18 = vector.load %arg6[%c0_19, %c0_20] : memref<1x64xf32, #tpu.memory_space<vmem>>, vector<1x64xf32>
      %19 = vector.broadcast %18 : vector<1x64xf32> to vector<16x64xf32>
      %20 = arith.addf %17, %19 : vector<16x64xf32>
      %c0_21 = arith.constant 0 : index
      %c0_22 = arith.constant 0 : index
      %21 = vector.load %arg10[%c0_21, %c0_22] : memref<16x64xf32, #tpu.memory_space<vmem>>, vector<16x64xf32>
      %c0_23 = arith.constant 0 : index
      %c0_24 = arith.constant 0 : index
      %22 = vector.load %arg7[%c0_23, %c0_24] : memref<1x64xf32, #tpu.memory_space<vmem>>, vector<1x64xf32>
      %23 = vector.broadcast %22 : vector<1x64xf32> to vector<16x64xf32>
      %24 = arith.addf %21, %23 : vector<16x64xf32>
      %25 = arith.negf %24 : vector<16x64xf32>
      %26 = math.exp %25 : vector<16x64xf32>
      %cst_25 = arith.constant 1.000000e+00 : f32
      %27 = vector.broadcast %cst_25 : f32 to vector<16x64xf32>
      %28 = arith.addf %27, %26 : vector<16x64xf32>
      %29 = arith.divf %27, %28 : vector<16x64xf32>
      %30 = arith.mulf %24, %29 : vector<16x64xf32>
      %31 = arith.mulf %20, %30 : vector<16x64xf32>
      %c0_26 = arith.constant 0 : index
      %c0_27 = arith.constant 0 : index
      %32 = vector.load %arg8[%c0_26, %c0_27] : memref<16x64xf32, #tpu.memory_space<vmem>>, vector<16x64xf32>
      tpu.vector_store %arg8[%c0_26, %c0_27], %31 {strides = array<i32>} : memref<16x64xf32, #tpu.memory_space<vmem>>, vector<16x64xf32>,
    } else {
    }
    return
  }
  func.func @transform_0(%arg0: i32, %arg1: i32, %arg2: i32) -> (i32, i32) {
    %c0_i32 = arith.constant 0 : i32
    return %arg0, %arg2 : i32, i32
  }
  func.func @transform_1(%arg0: i32, %arg1: i32, %arg2: i32) -> (i32, i32) {
    %c0_i32 = arith.constant 0 : i32
    return %arg2, %arg1 : i32, i32
  }
  func.func @transform_2(%arg0: i32, %arg1: i32, %arg2: i32) -> (i32, i32) {
    %c0_i32 = arith.constant 0 : i32
    return %arg2, %arg1 : i32, i32
  }
  func.func @transform_3(%arg0: i32, %arg1: i32, %arg2: i32) -> (i32, i32) {
    %c0_i32 = arith.constant 0 : i32
    %c0_i32_0 = arith.constant 0 : i32
    return %c0_i32, %arg1 : i32, i32
  }
  func.func @transform_4(%arg0: i32, %arg1: i32, %arg2: i32) -> (i32, i32) {
    %c0_i32 = arith.constant 0 : i32
    %c0_i32_0 = arith.constant 0 : i32
    return %c0_i32, %arg1 : i32, i32
  }
  func.func @transform_5(%arg0: i32, %arg1: i32, %arg2: i32) -> (i32, i32) {
    %c0_i32 = arith.constant 0 : i32
    return %arg0, %arg1 : i32, i32
  }
}

</mosaic_0001>

<bundles_post_ra>
// kernel: glu_forward.1
= control target key start
LH: loop header
LB: loop body
LE: loop exit
PB: predicated region body
PF: predicated region fallthrough
CT: control target
= control target key end

     0   :  { %vm38_vm0 = vcmask 261120   ;;  %vm25_vm1 = vcmask 523264   ;;  %v363_v6 = vmov 0.0   ;;  %s459_s0 = inlined_call_operand.vmem [shape: f32[16,32], index: 0, kind: input, shape index: {}]   ;;  %s460_s1 = inlined_call_operand.vmem [shape: f32[32,64], index: 1, kind: input, shape index: {}]   ;;  %s461_s2 = inlined_call_operand.vmem [shape: f32[32,64], index: 2, kind: input, shape index: {}]   ;;  %s462_s3 = inlined_call_operand.vmem [shape: f32[1,64], index: 3, kind: input, shape index: {}]   ;;  %s463_s4 = inlined_call_operand.vmem [shape: f32[1,64], index: 4, kind: input, shape index: {}]   ;;  %s464_s5 = inlined_call_operand.hbm [shape: f32[16,64], index: 5, kind: output, shape index: {}]  }
   0x1   :  { %v127_v0 = vld [vmem:[%s461_s2] sm:$0xff]  ;;  %v128_v1 = vld [vmem:[%s461_s2 + $0x8] sm:$0xff]  ;;  %v129_v2 = vld [vmem:[%s461_s2 + $0x10] sm:$0xff]  ;;  %29 = vst.msk [vmem:[#allocation3 + $0x8] sm:$0xff] %vm25_vm1, %v363_v6 }
   0x2   :  { %v319_v3 = vpack.c.bf16 %v128_v1, %v127_v0  ;;  %v130_v4 = vld [vmem:[%s461_s2 + $0x18] sm:$0xff]  ;;  %v30_v5 = vld [vmem:[%s459_s0] sm:$0xff]  ;;  %26 = vst.msk [vmem:[#allocation2] sm:$0xff] %vm25_vm1, %v363_v6  ;;  %27 = vst.msk [vmem:[#allocation2 + $0x8] sm:$0xff] %vm25_vm1, %v363_v6 }
   0x3   :  { %28 = vst.msk [vmem:[#allocation3] sm:$0xff] %vm25_vm1, %v363_v6  ;;  %v323_v7 = vpack.c.bf16 %v130_v4, %v129_v2  ;;  %308 = vmatprep.mubr.msk.f32.mxu1 %vm38_vm0, %v30_v5  ;;  %v34_v8 = vld [vmem:[%s460_s1] sm:$0xff]  ;;  %v35_v9 = vld [vmem:[%s460_s1 + $0x8] sm:$0xff]  ;;  %v36_v10 = vld [vmem:[%s460_s1 + $0x10] sm:$0xff]  ;;  %297 = vmatprep.mubr.msk.f32.mxu0 %vm38_vm0, %v30_v5 }
   0x4   :  { %320 = vmatprep.subr.bf16.mxu1 %v319_v3  ;;  %v311_v11 = vpack.c.bf16 %v35_v9, %v34_v8  ;;  %v37_v12 = vld [vmem:[%s460_s1 + $0x18] sm:$0xff] }
   0x5   :  { %10 = vsyncpa [#allocation5], 0  ;;  %322 = vmatpush3.bf16.msra.mxu1 %v319_v3  ;;  %v315_v13 = vpack.c.bf16 %v37_v12, %v36_v10  ;;  %v31_v14 = vld [vmem:[%s459_s0 + $0x8] sm:$0xff]  ;;  %v274_v27 = vld [vmem:[%s463_s4] ss:$0 sm:$0xff]  ;;  %s364_s4 = smov [#allocation4]  }
   0x6   :  { %324 = vmatprep.subr.bf16.mxu1 %v323_v7  ;;  %312 = vmatprep.subr.bf16.mxu0 %v311_v11  ;;  %v273_v39 = vld [vmem:[%s462_s3] ss:$0 sm:$0xff]  ;;  %s258_s14 = sshll.u32 %s364_s4, 4  ;;  %s259_s14 = int_to_ptr.vmem [resolvable:$true] %s258_s14 }
   0x7   :  { %314 = vmatpush3.bf16.msra.mxu0 %v311_v11  ;;  %s339_s15 = scalar_lea.vmem %s259_s14, 256  ;;  %p344_p1 = scmp.lt.s32.totalorder %s259_s14, %s259_s14 }
   0x8   :  { %316 = vmatprep.subr.bf16.mxu0 %v315_v13  ;;  %v126_v15 = vld [vmem:[#allocation3 + $0x8] sm:$0xff]  ;;  %p340_p0 = scmp.ne.s32.totalorder %s259_s14, %s339_s15  ;;  %p345_p2 = scmp.lt.s32.totalorder %s339_s15, %s339_s15 }
   0x9   :  { %326 = vmatpush3.bf16.msra.mxu1 %v323_v7  ;;  %v33_v18 = vld [vmem:[#allocation2 + $0x8] sm:$0xff]  ;;  %v32_v21 = vld [vmem:[#allocation2] sm:$0xff] }
   0xa   :  { %v125_v16 = vld [vmem:[#allocation3] sm:$0xff]  ;;  %p346_p3 = por %p345_p2, %p344_p1 }
   0xb   :  { %318 = vmatpush3.bf16.msra.mxu0 %v315_v13 }
   0xc   :  { %309 = vmatmul.mubr.msk.f32.vlgmr.msra.gmra.mrb[0].mxu1 %vm38_vm0, %v31_v14  ;;  %p347_p4 = pnand %p346_p3, %p340_p0 }
   0xe   :  { %298 = vmatmul.mubr.msk.f32.vlgmr.msra.gmra.mrb[0].mxu0 %vm38_vm0, %v31_v14 }
  0xdf   :  { %v310_v17 = vpop.f32.mrb[0].mxu1 }
  0xe0   :  { %v207_v19 = vadd.f32 %v310_v17, %v126_v15  ;;  %v197_v20 = vpop.f32.mrb[1].mxu1 }
  0xe1   :  { %v206_v22 = vadd.f32 %v197_v20, %v125_v16  ;;  %v299_v23 = vpop.f32.mrb[0].mxu0 }
  0xe2   :  { %209 = vst.msk [vmem:[#allocation3 + $0x8] sm:$0xff] %vm25_vm1, %v207_v19  ;;  %v121_v24 = vadd.f32 %v299_v23, %v33_v18  ;;  %v111_v25 = vpop.f32.mrb[1].mxu0 }
  0xe3   :  { %208 = vst.msk [vmem:[#allocation3] sm:$0xff] %vm25_vm1, %v206_v22  ;;  %v120_v26 = vadd.f32 %v111_v25, %v32_v21 }
  0xe4   :  { %124 = vst.msk [vmem:[#allocation2 + $0x8] sm:$0xff] %vm25_vm1, %v121_v24 }
  0xe5   :  { %123 = vst.msk [vmem:[#allocation2] sm:$0xff] %vm25_vm1, %v120_v26 }
  0xe9   :  { %v225_v28 = vld [vmem:[#allocation3 + $0x8] sm:$0xff] }
  0xea   :  { %v224_v29 = vld [vmem:[#allocation3] sm:$0xff]  ;;  %v234_v30 = vadd.f32 %v274_v27, %v225_v28 }
  0xeb   :  { %v233_v31 = vadd.f32 %v274_v27, %v224_v29  ;;  %v214_v38 = vld [vmem:[#allocation2 + $0x8] sm:$0xff] }
  0xec   :  { %v276_v32 = vmul.f32 -1.442695, %v234_v30  ;;  %v213_v40 = vld [vmem:[#allocation2] sm:$0xff]  ;;  %v223_v41 = vadd.f32 %v273_v39, %v214_v38 }
  0xed   :  { %v275_v33 = vmul.f32 -1.442695, %v233_v31  ;;  %v222_v43 = vadd.f32 %v273_v39, %v213_v40 }
  0xee   :  { %331 = vpow2.f32 %v276_v32 }
  0xef   :  { %333 = vpow2.f32 %v275_v33 }
  0xf8   :  { %v332_v34 = vpop.eup %331 }
  0xf9   :  { %v334_v35 = vpop.eup %333  ;;  %v242_v36 = vadd.f32 1.0, %v332_v34 }
  0xfa   :  { %v241_v37 = vadd.f32 1.0, %v334_v35 }
  0xfb   :  { %335 = vrcp.f32 %v242_v36 }
  0xfc   :  { %337 = vrcp.f32 %v241_v37 }
 0x105   :  { %v336_v42 = vpop.eup %335 }
 0x106   :  { %v338_v44 = vpop.eup %337  ;;  %v248_v45 = vmul.f32 %v336_v42, %v234_v30 }
 0x107   :  { %v247_v46 = vmul.f32 %v338_v44, %v233_v31 }
 0x108   :  { %v250_v47 = vmul.f32 %v248_v45, %v223_v41 }
 0x109   :  { %v249_v48 = vmul.f32 %v247_v46, %v222_v43 }
 0x10a   :  { %252 = vst.msk [vmem:[#allocation4 + $0x8] sm:$0xff] %vm25_vm1, %v250_v47 }
 0x10b   :  { %251 = vst.msk [vmem:[#allocation4] sm:$0xff] %vm25_vm1, %v249_v48 }
 0x10c   :  { %350 = shalt.err (!%p347_p4)
}
 0x10d   :  { %s351_s17 = scalar_lea.hbm %s464_s5, 256 }
 0x10e   :  { %p352_p5 = scmp.ne.s32.totalorder %s464_s5, %s351_s17  ;;  %p355_p6 = scmp.lt.u32.totalorder %s351_s17, %s464_s5 }
 0x110   :  { %p357_p7 = pnand %p355_p6, %p352_p5 }
 0x112   :  { %360 = shalt.err (!%p357_p7)
}
 0x113   :  { %s365_s22 = smov 128   ;;  %s366_s23 = smov 8  }
 0x114   :  { %264 = dma.vmem_to_hbm [thread:$0]  %s259_s14, 256, %s464_s5, [#allocation5], %s365_s22, %s365_s22, %s366_s23  }
 0x115   :  { %361 = dma.done.wait [#allocation5], 256  }
 0x116   :  { %362 = vsyncadd [#allocation5], 4294967040 }
 0x117   :  { %268 = vsyncpa [#allocation5], 1 }

</bundles_post_ra>
